<compile_context>
chip_gen: v6e
topology: v6e:2x2x1
jax: 0.10.0
libtpu: 0.0.40
codegen_flags: <defaults>
</compile_context>

<pallas_src>
import math

import jax
import jax.numpy as jnp
from jax.experimental import pallas as pl
from jax.experimental.pallas import tpu as pltpu


def _round_up(x: int, m: int) -> int:
    return ((x + m - 1) // m) * m


def _sublane(dtype) -> int:
    # Sublane packing: 8 rows for 4-byte, 16 for 2-byte, 32 for 1-byte dtypes.
    return {4: 8, 2: 16, 1: 32}.get(jnp.dtype(dtype).itemsize, 8)


def _vmem_budget():
    """Returns (tile-selection budget, vmem_limit_bytes), generation-aware."""
    cap = 64 << 20  # v7x has 64 MiB / TensorCore; safe fallback everywhere.
    try:
        cap = int(getattr(pltpu.get_tpu_info(), "vmem_capacity_bytes", cap))
    except Exception:
        pass
    budget = (cap * 3) // 4
    limit = min(cap - (2 << 20), budget + (8 << 20))
    return budget, limit


# ----------------------------- kernels -----------------------------


def _conv1d_resident_kernel(x_ref, w_ref, b_ref, o_ref):
    """One (tm, tn) output tile; operands carry full K, so a single MXU dot."""
    acc = jnp.dot(x_ref[...], w_ref[...], preferred_element_type=jnp.float32)
    o_ref[...] = (acc + b_ref[...].astype(jnp.float32)).astype(o_ref.dtype)


def _conv1d_ksplit_kernel(x_ref, w_ref, b_ref, o_ref, acc_ref):
    """K split across grid axis 2; f32 accumulator seeded with the bias."""
    k = pl.program_id(2)

    @pl.when(k == 0)
    def _init():
        acc_ref[...] = jnp.broadcast_to(
            b_ref[...].astype(jnp.float32), acc_ref.shape
        )

    acc_ref[...] += jnp.dot(
        x_ref[...], w_ref[...], preferred_element_type=jnp.float32
    )

    @pl.when(k == pl.num_programs(2) - 1)
    def _store():
        o_ref[...] = acc_ref[...].astype(o_ref.dtype)


# ----------------------------- wrapper -----------------------------


def conv1d(x, weight, bias, *, tm=512, tn=512, tk=2048, compute_dtype=None):
    """y = x @ weight + bias.   x: (..., in_dim) -> (..., out_dim)."""
    in_dim, out_dim = weight.shape
    assert x.shape[-1] == in_dim, "x last dim must equal weight in_dim"
    lead = x.shape[:-1]
    M = math.prod(lead)
    K, N = in_dim, out_dim

    if compute_dtype is not None:  # e.g. bf16 operands, f32 accumulation
        x = x.astype(compute_dtype)
        weight = weight.astype(compute_dtype)
    out_dtype = jnp.result_type(x.dtype, weight.dtype)

    xb = jnp.dtype(x.dtype).itemsize
    wb = jnp.dtype(weight.dtype).itemsize
    ob = jnp.dtype(out_dtype).itemsize
    bb = jnp.dtype(bias.dtype).itemsize
    sub = _sublane(x.dtype)
    budget, vmem_limit = _vmem_budget()

    # --- lane-dense output columns: pad N only when not 128-aligned ---
    Np = _round_up(N, 128)
    w2d = weight if Np == N else jnp.pad(weight, ((0, 0), (0, Np - N)))
    b2d = bias.reshape(1, N)
    if Np != N:
        b2d = jnp.pad(b2d, ((0, 0), (0, Np - N)))
    x2d = x.reshape(M, K)  # M is never padded (ragged last block is masked)

    # --- tile sizes: dtype-aware sublane rounding; tn must divide Np ---
    tm = max(sub, min(tm, _round_up(M, sub)))
    tn_cands = [t for t in range(128, min(tn, Np) + 1, 128) if Np % t == 0]
    tn = max(tn_cands)

    # ----- try the weight-resident, single-K-step schedule first -----
    def resident_fp(tm_, tn_):
        return (2 * tm_ * K * xb + 2 * K * tn_ * wb
                + 2 * tm_ * tn_ * ob + 2 * tn_ * bb)

    tm_r, tn_r = tm, tn
    while resident_fp(tm_r, tn_r) > budget:
        x_panel, w_panel = tm_r * K * xb, K * tn_r * wb
        if x_panel >= w_panel and tm_r > sub:
            tm_r = max(sub, _round_up(tm_r // 2, sub))
        elif tn_r > 128:
            tn_r = max(t for t in tn_cands if t < tn_r)
        elif tm_r > sub:
            tm_r = max(sub, _round_up(tm_r // 2, sub))
        else:
            break
    use_resident = resident_fp(tm_r, tn_r) <= budget

    if use_resident:
        tm, tn = tm_r, tn_r
        Mt, Nt = pl.cdiv(M, tm), Np // tn

        # Grid order that minimizes HBM traffic: the operand whose block index
        # is constant across the INNER axis is DMA'd only once overall.
        n_outer_bytes = Nt * M * K * xb + K * Np * wb   # weight read once
        m_outer_bytes = M * K * xb + Mt * K * Np * wb   # x read once
        if n_outer_bytes <= m_outer_bytes:
            grid = (Nt, Mt)
            x_map = lambda j, i: (i, 0)
            w_map = lambda j, i: (0, j)
            o_map = lambda j, i: (i, j)
        else:
            grid = (Mt, Nt)
            x_map = lambda i, j: (i, 0)
            w_map = lambda i, j: (0, j)
            o_map = lambda i, j: (i, j)

        # Decode / GEMV: pure weight streaming -> deeper weight buffering.
        if M <= 64 and Nt >= 3:
            w_spec = pl.BlockSpec((K, tn), w_map, pipeline_mode=pl.Buffered(3))
        else:
            w_spec = pl.BlockSpec((K, tn), w_map)

        cost = pl.CostEstimate(
            flops=2 * M * K * Np,
            transcendentals=0,
            bytes_accessed=(min(n_outer_bytes, m_outer_bytes)
                            + Np * bb + M * Np * ob),
        )

        out = pl.pallas_call(
            _conv1d_resident_kernel,
            out_shape=jax.ShapeDtypeStruct((M, Np), out_dtype),
            grid_spec=pltpu.PrefetchScalarGridSpec(
                num_scalar_prefetch=0,
                grid=grid,
                in_specs=[
                    pl.BlockSpec((tm, K), x_map),   # x row panel (full K)
                    w_spec,                          # weight K x tn panel
                    pl.BlockSpec((1, tn), w_map),    # bias: same (0, j) index
                ],
                out_specs=pl.BlockSpec((tm, tn), o_map),
            ),
            compiler_params=pltpu.CompilerParams(
                dimension_semantics=("parallel", "parallel"),
                vmem_limit_bytes=vmem_limit,
            ),
            cost_estimate=cost,
        )(x2d, w2d, b2d)
    else:
        # ----- K-split fallback (huge K / f32 footprints) -----
        tk = min(tk, _round_up(K, 128))

        def ksplit_fp(tm_, tn_, tk_):
            return (2 * tm_ * tk_ * xb + 2 * tk_ * tn_ * wb
                    + 2 * tm_ * tn_ * ob + tm_ * tn_ * 4 + 2 * tn_ * bb)

        while ksplit_fp(tm, tn, tk) > budget and tk > 512:
            tk = max(512, _round_up(tk // 2, 128))
        while ksplit_fp(tm, tn, tk) > budget and tm > sub:
            tm = max(sub, _round_up(tm // 2, sub))
        while ksplit_fp(tm, tn, tk) > budget and tn > 128:
            tn = max(t for t in tn_cands if t < tn)

        Kp = _round_up(K, tk)
        xk = x2d if Kp == K else jnp.pad(x2d, ((0, 0), (0, Kp - K)))
        wk = w2d if Kp == K else jnp.pad(w2d, ((0, Kp - K), (0, 0)))
        Mt, Nt, Kt = pl.cdiv(M, tm), Np // tn, Kp // tk

        cost = pl.CostEstimate(
            flops=2 * M * Kp * Np,
            transcendentals=0,
            bytes_accessed=(Nt * M * Kp * xb + Mt * Kp * Np * wb
                            + Np * bb + M * Np * ob),
        )

        out = pl.pallas_call(
            _conv1d_ksplit_kernel,
            out_shape=jax.ShapeDtypeStruct((M, Np), out_dtype),
            grid_spec=pltpu.PrefetchScalarGridSpec(
                num_scalar_prefetch=0,
                grid=(Mt, Nt, Kt),
                in_specs=[
                    pl.BlockSpec((tm, tk), lambda i, j, k: (i, k)),
                    pl.BlockSpec((tk, tn), lambda i, j, k: (k, j)),
                    pl.BlockSpec((1, tn), lambda i, j, k: (0, j)),
                ],
                out_specs=pl.BlockSpec((tm, tn), lambda i, j, k: (i, j)),
                scratch_shapes=[pltpu.VMEM((tm, tn), jnp.float32)],
            ),
            compiler_params=pltpu.CompilerParams(
                dimension_semantics=("parallel", "parallel", "arbitrary"),
                vmem_limit_bytes=vmem_limit,
            ),
            cost_estimate=cost,
        )(xk, wk, b2d)

    return out[:, :N].reshape(*lead, N)


if __name__ == "__main__":
    # Deterministic params mirroring the PyTorch module:
    #   weight ~ Normal(0, 0.02), shape (in_dim, out_dim); bias = zeros.
    batch, seq, in_dim, out_dim = 2, 8, 32, 64

    key = jax.random.PRNGKey(0)
    kx, kw = jax.random.split(key)
    x = jax.random.normal(kx, (batch, seq, in_dim), dtype=jnp.float32)
    weight = 0.02 * jax.random.normal(kw, (in_dim, out_dim), dtype=jnp.float32)
    bias = jnp.zeros((out_dim,), dtype=jnp.float32)

    y = conv1d(x, weight, bias)
    jax.block_until_ready(y)

    y_ref = x @ weight + bias
    assert y.shape == (batch, seq, out_dim)
    assert jnp.allclose(y, y_ref, atol=1e-5, rtol=1e-5)

    print("KERNEL_OK")
</pallas_src>

<mosaic_0001>
module attributes {stable_mosaic.version = 11 : i64} {
  func.func @_conv1d_resident_kernel(%arg0: i32, %arg1: i32, %arg2: memref<16x32xf32, #tpu.memory_space<vmem>>, %arg3: memref<32x128xf32, #tpu.memory_space<vmem>>, %arg4: memref<1x128xf32, #tpu.memory_space<vmem>>, %arg5: memref<16x128xf32, #tpu.memory_space<vmem>>) attributes {dimension_semantics = [#tpu.dimension_semantics<parallel>, #tpu.dimension_semantics<parallel>], iteration_bounds = array<i64: 1, 1>, scalar_prefetch = 0 : i64, scratch_operands = 0 : i64, tpu.core_type = #tpu.core_type<tc>, window_params = [{transform_indices = @transform_0, window_bounds = array<i64: 16, 32>}, {transform_indices = @transform_1, window_bounds = array<i64: 32, 128>}, {transform_indices = @transform_2, window_bounds = array<i64: 1, 128>}, {transform_indices = @transform_3, window_bounds = array<i64: 16, 128>}]} {
    %c0 = arith.constant 0 : index
    %c0_0 = arith.constant 0 : index
    %0 = vector.load %arg2[%c0, %c0_0] : memref<16x32xf32, #tpu.memory_space<vmem>>, vector<16x32xf32>
    %c0_1 = arith.constant 0 : index
    %c0_2 = arith.constant 0 : index
    %1 = vector.load %arg3[%c0_1, %c0_2] : memref<32x128xf32, #tpu.memory_space<vmem>>, vector<32x128xf32>
    %cst = arith.constant dense<0.000000e+00> : vector<16x128xf32>
    %2 = tpu.matmul %0, %1, %cst {dimension_numbers = #tpu.dot_dimension_numbers<[1], [0], [0], [1], [0, 0, 1, 1], [], []>} : vector<16x32xf32>, vector<32x128xf32>, vector<16x128xf32> -> vector<16x128xf32>
    %c0_3 = arith.constant 0 : index
    %c0_4 = arith.constant 0 : index
    %3 = vector.load %arg4[%c0_3, %c0_4] : memref<1x128xf32, #tpu.memory_space<vmem>>, vector<1x128xf32>
    %4 = vector.broadcast %3 : vector<1x128xf32> to vector<16x128xf32>
    %5 = arith.addf %2, %4 : vector<16x128xf32>
    %c0_5 = arith.constant 0 : index
    %c0_6 = arith.constant 0 : index
    %6 = vector.load %arg5[%c0_5, %c0_6] : memref<16x128xf32, #tpu.memory_space<vmem>>, vector<16x128xf32>
    tpu.vector_store %arg5[%c0_5, %c0_6], %5 {strides = array<i32>} : memref<16x128xf32, #tpu.memory_space<vmem>>, vector<16x128xf32>,
    return
  }
  func.func @transform_0(%arg0: i32, %arg1: i32) -> (i32, i32) {
    %c0_i32 = arith.constant 0 : i32
    %c0_i32_0 = arith.constant 0 : i32
    return %arg1, %c0_i32 : i32, i32
  }
  func.func @transform_1(%arg0: i32, %arg1: i32) -> (i32, i32) {
    %c0_i32 = arith.constant 0 : i32
    %c0_i32_0 = arith.constant 0 : i32
    return %c0_i32, %arg0 : i32, i32
  }
  func.func @transform_2(%arg0: i32, %arg1: i32) -> (i32, i32) {
    %c0_i32 = arith.constant 0 : i32
    %c0_i32_0 = arith.constant 0 : i32
    return %c0_i32, %arg0 : i32, i32
  }
  func.func @transform_3(%arg0: i32, %arg1: i32) -> (i32, i32) {
    %c0_i32 = arith.constant 0 : i32
    return %arg1, %arg0 : i32, i32
  }
}

</mosaic_0001>

<bundles_post_ra>
// kernel: tpu_custom_call.1
= control target key start
LH: loop header
LB: loop body
LE: loop exit
PB: predicated region body
PF: predicated region fallthrough
CT: control target
= control target key end

     0   :  { %8 = vsyncpa [#allocation3], 0  ;;  %s297_s0 = inlined_call_operand.hbm [shape: f32[16,32], index: 0, kind: input, shape index: {}]   ;;  %s298_s1 = inlined_call_operand.hbm [shape: f32[32,128], index: 1, kind: input, shape index: {}]   ;;  %s299_s2 = inlined_call_operand.vmem [shape: f32[1,128], index: 2, kind: input, shape index: {}]   ;;  %s300_s3 = inlined_call_operand.hbm [shape: f32[16,128], index: 3, kind: output, shape index: {}]  }
   0x1   :  { %9 = vsyncpa [#allocation6], 0 }
   0x2   :  { %10 = vsyncpa [#allocation4], 0  ;;  %s249_s12 = smov [#allocation2]  }
   0x3   :  { %s16_s13 = sshll.u32 %s249_s12, 4  ;;  %s17_s13 = int_to_ptr.vmem [resolvable:$true] %s16_s13 }
   0x4   :  { %s191_s14 = scalar_lea.vmem %s17_s13, 256  ;;  %p196_p1 = scmp.lt.s32.totalorder %s17_s13, %s17_s13 }
   0x5   :  { %p192_p0 = scmp.ne.s32.totalorder %s17_s13, %s191_s14  ;;  %p197_p2 = scmp.lt.s32.totalorder %s191_s14, %s191_s14 }
   0x7   :  { %p198_p3 = por %p197_p2, %p196_p1 }
   0x9   :  { %p199_p4 = pnand %p198_p3, %p192_p0 }
   0xb   :  { %202 = shalt.err (!%p199_p4)
}
   0xc   :  { %s250_s15 = smov 128   ;;  %s251_s16 = smov 8  }
   0xd   :  { %22 = dma.hbm_to_vmem [thread:$0]  %s297_s0, 256, %s17_s13, [#allocation3], %s250_s15, %s250_s15, %s251_s16  }
   0xe   :  { %s252_s19 = smov [#allocation5]  }
   0xf   :  { %s28_s20 = sshll.u32 %s252_s19, 4  ;;  %s29_s20 = int_to_ptr.vmem [resolvable:$true] %s28_s20 }
  0x10   :  { %s211_s21 = scalar_lea.vmem %s29_s20, 512  ;;  %p216_p6 = scmp.lt.s32.totalorder %s29_s20, %s29_s20 }
  0x11   :  { %p212_p5 = scmp.ne.s32.totalorder %s29_s20, %s211_s21  ;;  %p217_p7 = scmp.lt.s32.totalorder %s211_s21, %s211_s21 }
  0x13   :  { %p218_p8 = por %p217_p7, %p216_p6 }
  0x15   :  { %p219_p9 = pnand %p218_p8, %p212_p5 }
  0x17   :  { %222 = shalt.err (!%p219_p9)
}
  0x18   :  { %34 = dma.hbm_to_vmem [thread:$0]  %s298_s1, 512, %s29_s20, [#allocation6], %s250_s15, %s250_s15, %s251_s16  }
  0x19   :  { %243 = dma.done.wait [#allocation3], 256  }
  0x1a   :  { %244 = vsyncadd [#allocation3], 4294967040 }
  0x1b   :  { %245 = dma.done.wait [#allocation6], 512  }
  0x1c   :  { %246 = vsyncadd [#allocation6], 4294966784  ;;  %vm56_vm0 = vcmask 261120   ;;  %v48_v0 = vld [vmem:[#allocation5 + $0x18] sm:$0xff]  ;;  %v47_v1 = vld [vmem:[#allocation5 + $0x10] sm:$0xff]  ;;  %s253_s24 = smov [#allocation7]  }
  0x1d   :  { %167 = vmatprep.subr.mxu0 %v48_v0  ;;  %v43_v2 = vld [vmem:[#allocation2] sm:$0xff]  ;;  %v46_v3 = vld [vmem:[#allocation5 + $0x8] sm:$0xff]  ;;  %v45_v4 = vld [vmem:[#allocation5] sm:$0xff]  ;;  %s145_s25 = sshll.u32 %s253_s24, 4  ;;  %s146_s25 = int_to_ptr.vmem [resolvable:$true] %s145_s25 }
  0x1e   :  { %168 = vmatpush3.msra.mxu0 %v48_v0  ;;  %175 = vmatprep.mubr.msk.f32.mxu0 %vm56_vm0, %v43_v2  ;;  %v44_v5 = vld [vmem:[#allocation2 + $0x8] sm:$0xff]  ;;  %v158_v6 = vld [vmem:[%s299_s2] ss:$0 sm:$0xff]  ;;  %s223_s26 = scalar_lea.vmem %s146_s25, 256  ;;  %p228_p11 = scmp.lt.s32.totalorder %s146_s25, %s146_s25 }
  0x1f   :  { %169 = vmatprep.subr.mxu0 %v47_v1  ;;  %p224_p10 = scmp.ne.s32.totalorder %s146_s25, %s223_s26  ;;  %p229_p12 = scmp.lt.s32.totalorder %s223_s26, %s223_s26 }
  0x20   :  { %170 = vmatpush3.msra.mxu0 %v47_v1 }
  0x21   :  { %171 = vmatprep.subr.mxu0 %v46_v3  ;;  %p230_p13 = por %p229_p12, %p228_p11 }
  0x22   :  { %172 = vmatpush3.msra.mxu0 %v46_v3 }
  0x23   :  { %173 = vmatprep.subr.mxu0 %v45_v4  ;;  %p231_p0 = pnand %p230_p13, %p224_p10 }
  0x24   :  { %174 = vmatpush3.msra.mxu0 %v45_v4 }
  0x25   :  { %176 = vmatmul.mubr.msk.f32.vlgmr.msra.gmra.mxu0 %vm56_vm0, %v44_v5 }
  0xe5   :  { %v177_v7 = vpop.f32.mrf.mxu0 }
  0xe6   :  { %v135_v8 = vadd.f32 %v177_v7, %v158_v6 }
  0xe7   :  { %v129_v9 = vpop.f32.mrf.mxu0 }
  0xe8   :  { %139 = vst [vmem:[#allocation7 + $0x8] sm:$0xff] %v135_v8  ;;  %v130_v10 = vadd.f32 %v158_v6, %v129_v9 }
  0xea   :  { %138 = vst [vmem:[#allocation7] sm:$0xff] %v130_v10 }
  0xeb   :  { %234 = shalt.err (!%p231_p0)
}
  0xec   :  { %151 = dma.vmem_to_hbm [thread:$0]  %s146_s25, 256, %s300_s3, [#allocation4], %s250_s15, %s250_s15, %s251_s16  }
  0xed   :  { %247 = dma.done.wait [#allocation4], 256  }
  0xee   :  { %248 = vsyncadd [#allocation4], 4294967040 }
  0xef   :  { %155 = vsyncpa [#allocation3], 1 }
  0xf0   :  { %156 = vsyncpa [#allocation6], 1 }
  0xf1   :  { %157 = vsyncpa [#allocation4], 1 }

</bundles_post_ra>
